<compile_context>
chip_gen: v5e
topology: v5e:2x2
jax: 0.10.0
libtpu: 0.0.40
codegen_flags: <defaults>
</compile_context>

<pallas_src>
import functools

import jax
import jax.numpy as jnp
from jax import lax
from jax.experimental import pallas as pl
from jax.experimental.pallas import tpu as pltpu


def _nll_kernel(yp_ref, yt_ref, ones_ref, out_ref, acc_ref, *, n_samples):
    p = pl.program_id(0)                     # parallel half (2nd TC on v7x)
    t = pl.program_id(1)                     # row-tile within the half
    t_last = pl.num_programs(1) - 1

    @pl.when(t == 0)
    def _init():
        acc_ref[...] = jnp.zeros_like(acc_ref)

    yp = yp_ref[...]                         # (TN, W)  native dtype (no upcast)
    yt = yt_ref[...]                         # (TN, F)  int32 lane-index targets
    tn, w = yp.shape
    f = yt.shape[1]

    # One-hot selection mask: OR over the F folded segments of a lane-broadcast
    # compare (pure VPU work; the heavy reduction goes to the MXU below).
    col = lax.broadcasted_iota(jnp.int32, (tn, w), 1)
    mask = col == yt[:, 0:1]
    for s in range(1, f):
        mask = jnp.logical_or(mask, col == yt[:, s:s + 1])
    sel = jnp.where(mask, yp, jnp.zeros_like(yp))        # one nonzero per segment

    if w % 128 == 0:
        # MXU mat-vec: (TN, W) @ (W, F) block-diagonal ones -> per-sample picked
        # probability, accumulated in f32 (exact: a single nonzero term x 1.0).
        picked = jnp.dot(sel, ones_ref[...], preferred_element_type=jnp.float32)
    else:
        # TODO(synk): class counts that are not lane-aligned (C % 128 != 0 and
        # not foldable) keep the VPU/XLU lane reduce instead of the MXU path.
        picked = jnp.sum(sel.astype(jnp.float32), axis=1, keepdims=True)

    # Sample-validity mask on the small (TN, F) picked vector.  Covers wrapper
    # padding, Pallas block padding and clamped overflow tiles: invalid samples
    # get picked = 1.0 so log() contributes exactly 0.
    base = (p * pl.num_programs(1) + t) * tn             # unclamped folded-row offset
    row_iota = lax.broadcasted_iota(jnp.int32, (tn, f), 0)
    seg_iota = lax.broadcasted_iota(jnp.int32, (tn, f), 1)
    sample_idx = (base + row_iota) * f + seg_iota
    picked = jnp.where(sample_idx < n_samples, picked, jnp.ones_like(picked))

    # Only TN*F logs per tile (EUP slot), then accumulate the raw sum.
    logp = jnp.log(picked)                                # (TN, F) f32
    part = jnp.sum(logp, axis=0, keepdims=True)           # (1, F)   sublane reduce
    acc_ref[...] += jnp.sum(part, axis=1, keepdims=True)  # (1, 1)

    @pl.when(t == t_last)
    def _finalize():
        # Lane-dense (1, 8, 128) output block (unmasked vst); wrapper reads [0,0].
        out_ref[...] = jnp.broadcast_to(acc_ref[...].reshape(1, 1, 1), out_ref.shape)


def loss_func(y_pred: jax.Array, y_true: jax.Array, tile_rows: int | None = None) -> jax.Array:
    """NLLLoss(log(y_pred), y_true) with mean reduction (PyTorch default).

    TODO(synk): nn.NLLLoss raises on out-of-range targets; here such rows
    silently pick probability 0 (loss becomes +inf / NaN) instead of erroring.
    """
    n, c = y_pred.shape
    y_true = y_true.astype(jnp.int32)

    # --- lane folding: pack 128//C samples per 128-lane row when C | 128 -----
    # (restricted to C in {16, 32, 64}: smaller C would need a long compare
    #  chain, C >= 128 is already lane-dense.)
    fold = 128 // c if (128 % c == 0 and 16 <= c < 128) else 1
    if fold > 1:
        pad = (-n) % fold
        if pad:
            # TODO(synk): this pad copies y_pred once; batches that are a
            # multiple of 128//C avoid it.
            y_pred = jnp.pad(y_pred, ((0, pad), (0, 0)))
            y_true = jnp.pad(y_true, ((0, pad),))
        n_rows = (n + pad) // fold
        w = c * fold                                      # == 128
        yp2 = y_pred.reshape(n_rows, w)                   # free row-major view
        lane_tgt = (y_true + c * (jnp.arange(n + pad, dtype=jnp.int32) % fold)
                    ).reshape(n_rows, fold)
    else:
        n_rows, w = n, c
        yp2 = y_pred
        lane_tgt = y_true.reshape(n, 1)

    # Block-diagonal ones matrix for the MXU reduce (resident in VMEM).
    seg_of_lane = jnp.arange(w, dtype=jnp.int32)[:, None] // c          # (W, 1)
    ones_col = (seg_of_lane == jnp.arange(fold, dtype=jnp.int32)[None, :]
                ).astype(y_pred.dtype)                                   # (W, F)

    # --- row-tile size: largest tile whose lane-padded pipeline VMEM fits
    #     ~12 MiB (2 double-buffers + ~1 tile of temporaries for y_pred, plus
    #     the lane-padded int32 target buffers) — v7x-safe under the 32 MiB
    #     scoped limit, multi-MiB per-step DMAs for the usual shapes.
    if tile_rows is None:
        itemsize = jnp.dtype(y_pred.dtype).itemsize
        padded_w = ((w + 127) // 128) * 128
        bytes_per_row = 3 * padded_w * itemsize + 3 * 128 * 4
        tn = (12 * 1024 * 1024) // bytes_per_row
    else:
        tn = tile_rows
    tn = max(8, (tn // 8) * 8)
    tn = min(tn, max(8, ((n_rows + 7) // 8) * 8))

    nb = pl.cdiv(n_rows, tn)                 # number of folded-row blocks
    p_halves = 2 if nb >= 2 else 1           # leading parallel axis (2nd TC on v7x)
    t_per = pl.cdiv(nb, p_halves)

    def row_block(pi, ti):
        # Clamp so no DMA indexes past the last real block; overflow steps are
        # fully discarded by the in-kernel sample-validity mask.
        return (jnp.minimum(pi * t_per + ti, nb - 1), 0)

    out = pl.pallas_call(
        functools.partial(_nll_kernel, n_samples=n),
        out_shape=jax.ShapeDtypeStruct((p_halves, 8, 128), jnp.float32),
        grid=(p_halves, t_per),
        in_specs=[
            pl.BlockSpec((tn, w), row_block),                # y_pred rows (native dtype)
            pl.BlockSpec((tn, fold), row_block),             # lane-index targets
            pl.BlockSpec((w, fold), lambda pi, ti: (0, 0)),  # resident ones matrix
        ],
        out_specs=pl.BlockSpec((1, 8, 128), lambda pi, ti: (pi, 0, 0)),
        scratch_shapes=[pltpu.VMEM((1, 1), jnp.float32)],
        compiler_params=pltpu.CompilerParams(
            # TODO(synk): on v7x verify "parallel" actually splits the leading
            # axis across the 2 TensorCores; if not, switch to CORE_PARALLEL.
            dimension_semantics=("parallel", "arbitrary"),
            vmem_limit_bytes=32 * 1024 * 1024,
        ),
    )(yp2, lane_tgt, ones_col)

    partial_sums = out[:, 0, 0]                              # (p_halves,)
    return -jnp.sum(partial_sums) / n


if __name__ == "__main__":
    key = jax.random.PRNGKey(0)
    k1, k2, k3, k4 = jax.random.split(key, 4)

    def reference(yp, yt):
        nn = yp.shape[0]
        return -jnp.mean(jnp.log(yp)[jnp.arange(nn), yt])

    # Case 1: C=32 -> lane folding (fold=4), N=70 -> wrapper pad (70 % 4 != 0).
    N, C = 70, 32
    y_pred = jax.nn.softmax(jax.random.normal(k1, (N, C), dtype=jnp.float32), axis=-1)
    y_true = jax.random.randint(k2, (N,), 0, C, dtype=jnp.int32)
    ref = reference(y_pred, y_true)

    # Forced tiny tile: exercises the (parallel, arbitrary) grid, the ragged
    # last block, the clamped overflow step and the MXU reduce path.
    loss_tiled = loss_func(y_pred, y_true, tile_rows=8)
    jax.block_until_ready(loss_tiled)
    assert jnp.allclose(loss_tiled, ref, rtol=1e-4, atol=1e-6), (loss_tiled, ref)

    # Default (auto) tile size: single-block path.
    loss_auto = loss_func(y_pred, y_true)
    jax.block_until_ready(loss_auto)
    assert jnp.allclose(loss_auto, ref, rtol=1e-4, atol=1e-6), (loss_auto, ref)

    # Case 2: C=10 (does not divide 128) -> no folding, VPU/XLU fallback reduce.
    N2, C2 = 20, 10
    y_pred2 = jax.nn.softmax(jax.random.normal(k3, (N2, C2), dtype=jnp.float32), axis=-1)
    y_true2 = jax.random.randint(k4, (N2,), 0, C2, dtype=jnp.int32)
    ref2 = reference(y_pred2, y_true2)
    loss2 = loss_func(y_pred2, y_true2)
    jax.block_until_ready(loss2)
    assert jnp.allclose(loss2, ref2, rtol=1e-4, atol=1e-6), (loss2, ref2)

    print("KERNEL_OK")
</pallas_src>

<mosaic_0001>
module attributes {stable_mosaic.version = 11 : i64} {
  func.func @_nll_kernel(%arg0: i32, %arg1: i32, %arg2: memref<8x128xf32, #tpu.memory_space<vmem>>, %arg3: memref<8x4xi32, #tpu.memory_space<vmem>>, %arg4: memref<128x4xf32, #tpu.memory_space<vmem>>, %arg5: memref<1x8x128xf32, #tpu.memory_space<vmem>>, %arg6: memref<1x1xf32, #tpu.memory_space<vmem>>) attributes {dimension_semantics = [#tpu.dimension_semantics<parallel>, #tpu.dimension_semantics<arbitrary>], iteration_bounds = array<i64: 2, 2>, scalar_prefetch = 0 : i64, scratch_operands = 1 : i64, tpu.core_type = #tpu.core_type<tc>, window_params = [{transform_indices = @transform_0, window_bounds = array<i64: 8, 128>}, {transform_indices = @transform_1, window_bounds = array<i64: 8, 4>}, {pipeline_mode = #tpu.pipeline_mode<synchronous>, transform_indices = @transform_2, window_bounds = array<i64: 128, 4>}, {transform_indices = @transform_3, window_bounds = array<i64: 1, 8, 128>}]} {
    %c0_i32 = arith.constant 0 : i32
    %0 = arith.cmpi eq, %arg1, %c0_i32 : i32
    %1 = arith.extui %0 : i1 to i32
    %c0_i32_0 = arith.constant 0 : i32
    %2 = arith.cmpi ne, %1, %c0_i32_0 : i32
    scf.if %2 {
      %cst_15 = arith.constant 0.000000e+00 : f32
      %50 = vector.broadcast %cst_15 : f32 to vector<1x1xf32>
      %c0_16 = arith.constant 0 : index
      %c0_17 = arith.constant 0 : index
      %51 = vector.load %arg6[%c0_16, %c0_17] : memref<1x1xf32, #tpu.memory_space<vmem>>, vector<1x1xf32>
      tpu.vector_store %arg6[%c0_16, %c0_17], %50 {strides = array<i32>} : memref<1x1xf32, #tpu.memory_space<vmem>>, vector<1x1xf32>,
    } else {
    }
    %c0 = arith.constant 0 : index
    %c0_1 = arith.constant 0 : index
    %3 = vector.load %arg2[%c0, %c0_1] : memref<8x128xf32, #tpu.memory_space<vmem>>, vector<8x128xf32>
    %c0_2 = arith.constant 0 : index
    %c0_3 = arith.constant 0 : index
    %4 = vector.load %arg3[%c0_2, %c0_3] : memref<8x4xi32, #tpu.memory_space<vmem>>, vector<8x4xi32>
    %5 = tpu.iota {dimensions = array<i32: 1>} : vector<8x128xi32>
    %6 = vector.extract_strided_slice %4 {offsets = [0, 0], sizes = [8, 1], strides = [1, 1]} : vector<8x4xi32> to vector<8x1xi32>
    %7 = vector.broadcast %6 : vector<8x1xi32> to vector<8x128xi32>
    %8 = arith.cmpi eq, %5, %7 : vector<8x128xi32>
    %9 = vector.extract_strided_slice %4 {offsets = [0, 1], sizes = [8, 1], strides = [1, 1]} : vector<8x4xi32> to vector<8x1xi32>
    %10 = vector.broadcast %9 : vector<8x1xi32> to vector<8x128xi32>
    %11 = arith.cmpi eq, %5, %10 : vector<8x128xi32>
    %12 = arith.ori %8, %11 : vector<8x128xi1>
    %13 = vector.extract_strided_slice %4 {offsets = [0, 2], sizes = [8, 1], strides = [1, 1]} : vector<8x4xi32> to vector<8x1xi32>
    %14 = vector.broadcast %13 : vector<8x1xi32> to vector<8x128xi32>
    %15 = arith.cmpi eq, %5, %14 : vector<8x128xi32>
    %16 = arith.ori %12, %15 : vector<8x128xi1>
    %17 = vector.extract_strided_slice %4 {offsets = [0, 3], sizes = [8, 1], strides = [1, 1]} : vector<8x4xi32> to vector<8x1xi32>
    %18 = vector.broadcast %17 : vector<8x1xi32> to vector<8x128xi32>
    %19 = arith.cmpi eq, %5, %18 : vector<8x128xi32>
    %20 = arith.ori %16, %19 : vector<8x128xi1>
    %cst = arith.constant 0.000000e+00 : f32
    %21 = vector.broadcast %cst : f32 to vector<8x128xf32>
    %22 = arith.select %20, %3, %21 : vector<8x128xi1>, vector<8x128xf32>
    %c0_4 = arith.constant 0 : index
    %c0_5 = arith.constant 0 : index
    %23 = vector.load %arg4[%c0_4, %c0_5] : memref<128x4xf32, #tpu.memory_space<vmem>>, vector<128x4xf32>
    %cst_6 = arith.constant dense<0.000000e+00> : vector<8x4xf32>
    %24 = tpu.matmul %22, %23, %cst_6 {dimension_numbers = #tpu.dot_dimension_numbers<[1], [0], [0], [1], [0, 0, 1, 1], [], []>} : vector<8x128xf32>, vector<128x4xf32>, vector<8x4xf32> -> vector<8x4xf32>
    %c2_i32 = arith.constant 2 : i32
    %25 = arith.muli %arg0, %c2_i32 : i32
    %26 = arith.addi %25, %arg1 : i32
    %c8_i32 = arith.constant 8 : i32
    %27 = arith.muli %26, %c8_i32 : i32
    %28 = tpu.iota {dimensions = array<i32: 0>} : vector<8x4xi32>
    %29 = tpu.iota {dimensions = array<i32: 1>} : vector<8x4xi32>
    %30 = vector.broadcast %27 : i32 to vector<8x4xi32>
    %31 = arith.addi %30, %28 : vector<8x4xi32>
    %c4_i32 = arith.constant 4 : i32
    %32 = vector.broadcast %c4_i32 : i32 to vector<8x4xi32>
    %33 = arith.muli %31, %32 : vector<8x4xi32>
    %34 = arith.addi %33, %29 : vector<8x4xi32>
    %c70_i32 = arith.constant 70 : i32
    %35 = vector.broadcast %c70_i32 : i32 to vector<8x4xi32>
    %36 = arith.cmpi slt, %34, %35 : vector<8x4xi32>
    %cst_7 = arith.constant 1.000000e+00 : f32
    %37 = vector.broadcast %cst_7 : f32 to vector<8x4xf32>
    %38 = arith.select %36, %24, %37 : vector<8x4xi1>, vector<8x4xf32>
    %39 = math.log %38 : vector<8x4xf32>
    %cst_8 = arith.constant dense<0.000000e+00> : vector<4xf32>
    %40 = vector.multi_reduction <add>, %39, %cst_8 [0] : vector<8x4xf32> to vector<4xf32>
    %41 = vector.shape_cast %40 : vector<4xf32> to vector<1x4xf32>
    %c0_9 = arith.constant 0 : index
    %c0_10 = arith.constant 0 : index
    %42 = vector.load %arg6[%c0_9, %c0_10] : memref<1x1xf32, #tpu.memory_space<vmem>>, vector<1x1xf32>
    %cst_11 = arith.constant dense<0.000000e+00> : vector<1xf32>
    %43 = vector.multi_reduction <add>, %41, %cst_11 [1] : vector<1x4xf32> to vector<1xf32>
    %44 = vector.shape_cast %43 : vector<1xf32> to vector<1x1xf32>
    %45 = arith.addf %42, %44 : vector<1x1xf32>
    %c0_12 = arith.constant 0 : index
    %c0_13 = arith.constant 0 : index
    %46 = vector.load %arg6[%c0_12, %c0_13] : memref<1x1xf32, #tpu.memory_space<vmem>>, vector<1x1xf32>
    tpu.vector_store %arg6[%c0_12, %c0_13], %45 {strides = array<i32>} : memref<1x1xf32, #tpu.memory_space<vmem>>, vector<1x1xf32>,
    %c1_i32 = arith.constant 1 : i32
    %47 = arith.cmpi eq, %arg1, %c1_i32 : i32
    %48 = arith.extui %47 : i1 to i32
    %c0_i32_14 = arith.constant 0 : i32
    %49 = arith.cmpi ne, %48, %c0_i32_14 : i32
    scf.if %49 {
      %c0_15 = arith.constant 0 : index
      %c0_16 = arith.constant 0 : index
      %50 = vector.load %arg6[%c0_15, %c0_16] : memref<1x1xf32, #tpu.memory_space<vmem>>, vector<1x1xf32>
      %51 = vector.shape_cast %50 : vector<1x1xf32> to vector<1x1x1xf32>
      %52 = vector.shape_cast %51 : vector<1x1x1xf32> to vector<1x1x1xf32>
      %53 = vector.broadcast %52 : vector<1x1x1xf32> to vector<1x8x128xf32>
      %c0_17 = arith.constant 0 : index
      %c0_18 = arith.constant 0 : index
      %c0_19 = arith.constant 0 : index
      %54 = vector.load %arg5[%c0_17, %c0_18, %c0_19] : memref<1x8x128xf32, #tpu.memory_space<vmem>>, vector<1x8x128xf32>
      tpu.vector_store %arg5[%c0_17, %c0_18, %c0_19], %53 {strides = array<i32>} : memref<1x8x128xf32, #tpu.memory_space<vmem>>, vector<1x8x128xf32>,
    } else {
    }
    return
  }
  func.func @transform_0(%arg0: i32, %arg1: i32) -> (i32, i32) {
    %c2_i32 = arith.constant 2 : i32
    %0 = arith.muli %arg0, %c2_i32 : i32
    %1 = arith.addi %0, %arg1 : i32
    %c2_i32_0 = arith.constant 2 : i32
    %2 = arith.minsi %1, %c2_i32_0 : i32
    %c0_i32 = arith.constant 0 : i32
    %c0_i32_1 = arith.constant 0 : i32
    return %2, %c0_i32 : i32, i32
  }
  func.func @transform_1(%arg0: i32, %arg1: i32) -> (i32, i32) {
    %c2_i32 = arith.constant 2 : i32
    %0 = arith.muli %arg0, %c2_i32 : i32
    %1 = arith.addi %0, %arg1 : i32
    %c2_i32_0 = arith.constant 2 : i32
    %2 = arith.minsi %1, %c2_i32_0 : i32
    %c0_i32 = arith.constant 0 : i32
    %c0_i32_1 = arith.constant 0 : i32
    return %2, %c0_i32 : i32, i32
  }
  func.func @transform_2(%arg0: i32, %arg1: i32) -> (i32, i32) {
    %c0_i32 = arith.constant 0 : i32
    %c0_i32_0 = arith.constant 0 : i32
    %c0_i32_1 = arith.constant 0 : i32
    return %c0_i32, %c0_i32_0 : i32, i32
  }
  func.func @transform_3(%arg0: i32, %arg1: i32) -> (i32, i32, i32) {
    %c0_i32 = arith.constant 0 : i32
    %c0_i32_0 = arith.constant 0 : i32
    %c0_i32_1 = arith.constant 0 : i32
    return %arg0, %c0_i32, %c0_i32_0 : i32, i32, i32
  }
}

</mosaic_0001>

<bundles_post_ra>
// kernel: tpu_custom_call.1
= control target key start
LH: loop header
LB: loop body
LE: loop exit
PB: predicated region body
PF: predicated region fallthrough
CT: control target
= control target key end

     0   :  { %8 = vsyncpa [#allocation4], 0  ;;  %s881_s0 = inlined_call_operand.vmem [shape: f32[18,128], index: 0, kind: input, shape index: {}]   ;;  %s882_s1 = inlined_call_operand.vmem [shape: s32[18,4], index: 1, kind: input, shape index: {}]   ;;  %s883_s2 = inlined_call_operand.vmem [shape: f32[128,4], index: 2, kind: input, shape index: {}]   ;;  %s884_s3 = inlined_call_operand.hbm [shape: f32[2,8,128], index: 3, kind: output, shape index: {}]  }
   0x1   :  { %10 = vsyncpa [#allocation4 + $0x1], 0  ;;  %s692_s12 = smov 0   ;;  %s694_s13 = smov 0  }
   0x2   :  { %s696_s14 = smov 0   ;;  %s698_s15 = smov 0  }
   0x3   :  { %s700_s16 = smov 0   ;;  %s702_s17 = smov 0  }
   0x4   :  { %s704_s18 = smov 0   ;;  %s706_s19 = smov 0  }
   0x5 LB: > { %s455_s20 = sadd.s32 4294967295, %s664_s19   ;;  %s456_s21 = sadd.s32 4294967294, %s664_s19   ;;  %s664_s19 = sphi %s706_s19, %s16_s19   ;;  %s660_s18 = sphi %s704_s18, %s895_s18   ;;  %s656_s17 = sphi %s702_s17, %s894_s17   ;;  %s652_s16 = sphi %s700_s16, %s893_s16   ;;  %s648_s15 = sphi %s698_s15, %s892_s15   ;;  %s644_s14 = sphi %s696_s14, %s891_s14   ;;  %s640_s13 = sphi %s694_s13, %s890_s13   ;;  %s636_s12 = sphi %s692_s12, %s889_s12  }
   0x6   : > { %s25_s22 = sadd.s32 1, %s656_s17  ;;  %s28_s23 = sadd.s32 1, %s660_s18 }
   0x7   : > { %p26_p0 = scmp.ge.s32.totalorder %s25_s22, 2  ;;  %p134_p1 = scmp.ne.s32.totalorder %s644_s14, %s640_s13 }
   0x8   : > { %p135_p2 = scmp.eq.s32.totalorder %s455_s20, 3  ;;  %p140_p4 = scmp.ne.s32.totalorder %s640_s13, %s636_s12 }
   0x9   : > { %s897_s22 = smov (%p26_p0, %s25_s22), 0  ;;  %s899_s23 = smov (!%p26_p0, %s28_s23), %s660_s18 }
   0xa   : > { %p741_p3 = por %p135_p2, %p134_p1  ;;  %p30_p5 = scmp.ge.s32.totalorder %s899_s23, 2 }
   0xb   : > { %p141_p6 = scmp.eq.s32.totalorder %s456_s21, 3  ;;  %p463_p7 = scmp.ge.s32.totalorder %s664_s19, 1 }
   0xc   : > { %p192_p8 = scmp.lt.s32.totalorder %s664_s19, 5  ;;  %s901_s23 = smov (%p30_p5, %s899_s23), 0 }
   0xd   : > { %p751_p9 = por %p141_p6, %p140_p4  ;;  %s121_s26 = ssub.s32 %s660_s18, %s901_s23 }
   0xe   : > { %p193_p10 = pnand %p463_p7, %p192_p8  ;;  %s124_s27 = sadd.s32 1, %s644_s14 }
   0xf   : > { %p122_p11 = scmp.eq.s32.totalorder %s121_s26, 0  ;;  %s885_s29 = sand.u32 (!%p193_p10), 1, %s640_s13  }
  0x10   : > { %196 = sbr.rel (%p193_p10) target bundleno = 566 (0x236), region = 32  ;;  %s465_s30 = sshll.u32 (!%p193_p10), %s652_s16, 1 }
  0x11   : > { %s759_s28 = scalar_select %p122_p11, %s644_s14, %s124_s27  }
  0x12   : > { %s765_s4 = sshll.u32 (!%p193_p10), %s885_s29, 3  ;;  %s768_s5 = sadd.s32 (!%p193_p10), %s648_s15, %s465_s30 }
  0x13   : > { %p229_p12 = scmp.lt.s32.totalorder (!%p193_p10), %s768_s5, 2  ;;  %s226_s26 = scalar_lea.vmem (!%p193_p10), [#allocation3], %s765_s4 }
  0x14   : > { %p475_p13 = scmp.ne.s32.totalorder (!%p193_p10), %s648_s15, 0 }
  0x15   : > { %s230_s6 = scalar_select %p229_p12, %s768_s5, 2 }
  0x16   : > { %254 = sbr.rel (%p475_p13) target bundleno = 29 (0x1d), region = 36 }
  0x17   : > { %s903_s6 = smov (!%p229_p12, %s230_s6), 2 }
  0x18   : > { %s469_s7 = sshll.u32 %s903_s6, 3 }
  0x19   : > { %s775_s10 = scalar_lea.vmem %s881_s0, %s469_s7  ;;  %s246_s21 = scalar_lea.vmem %s882_s1, %s469_s7 }
  0x1b   : > { %vm255_vm0 = vcmask 0   ;;  %v666_v0 = vmov 0.0  }
  0x1c   : > { %256 = vst.msk [vmem:[#allocation2] sm:$0x1] %vm255_vm0, %v666_v0 }
  0x1d PF: > { %v258_v1 = vld [vmem:[%s246_s21] sm:$0xff]  ;;  %v296_v2 = vld [vmem:[%s883_s2 + $0x78] sm:$0xff]  ;;  %v667_v3 = vmov 0   ;;  %v668_v4 = vmov 2   ;;  %v295_v5 = vld [vmem:[%s883_s2 + $0x70] sm:$0xff]  ;;  %v669_v9 = vmov 1   ;;  %v259_v24 = vlaneseq }
  0x1e   : > { %561 = vset.pattern.permute.xlu0 %v667_v3  ;;  %563 = vset.pattern.permute.xlu1 %v668_v4  ;;  %v294_v6 = vld [vmem:[%s883_s2 + $0x68] sm:$0xff]  ;;  %v293_v7 = vld [vmem:[%s883_s2 + $0x60] sm:$0xff]  ;;  %v292_v8 = vld [vmem:[%s883_s2 + $0x58] sm:$0xff]  ;;  %v670_v10 = vmov 3   ;;  %s478_s29 = sshll.u32 %s768_s5, 3  ;;  %vm330_vm9 = vcmask 31744  }
  0x1f   : > { %262 = vperm.xlu0 %561, %v258_v1   ;;  %271 = vperm.xlu1 %563, %v258_v1   ;;  %v291_v11 = vld [vmem:[%s883_s2 + $0x50] sm:$0xff]  ;;  %v290_v12 = vld [vmem:[%s883_s2 + $0x48] sm:$0xff]  ;;  %v289_v13 = vld [vmem:[%s883_s2 + $0x40] sm:$0xff]  ;;  %v260_v25 = vand.u32 127, %v259_v24  ;;  %v321_v29 = vshrl.u32 %v259_v24, 7  ;;  %v322_v30 = vstv %s478_s29  ;;  %vm343_vm10 = vcmask 0  }
  0x20   : > { %297 = vmatpush.msra.mxu0 %v296_v2  ;;  %v288_v14 = vld [vmem:[%s883_s2 + $0x38] sm:$0xff]  ;;  %v287_v15 = vld [vmem:[%s883_s2 + $0x30] sm:$0xff]  ;;  %v286_v16 = vld [vmem:[%s883_s2 + $0x28] sm:$0xff]  ;;  %p479_p0 = scmp.ne.s32.totalorder %s648_s15, 1 }
  0x21   : > { %v285_v17 = vld [vmem:[%s883_s2 + $0x20] sm:$0xff]  ;;  %v284_v18 = vld [vmem:[%s883_s2 + $0x18] sm:$0xff]  ;;  %v283_v19 = vld [vmem:[%s883_s2 + $0x10] sm:$0xff]  ;;  %v323_v31 = vadd.s32 %v322_v30, %v321_v29 }
  0x22   : > { %298 = vmatpush.msra.mxu0 %v295_v5  ;;  %v282_v20 = vld [vmem:[%s883_s2 + $0x8] sm:$0xff]  ;;  %v281_v21 = vld [vmem:[%s883_s2] sm:$0xff] }
  0x23   : > { %v257_v28 = vld [vmem:[%s775_s10] sm:$0xff]  ;;  %v324_v32 = vmul.u32 4, %v323_v31 }
  0x24   : > { %299 = vmatpush.msra.mxu0 %v294_v6  ;;  %v338_v46 = vld [vmem:[#allocation2] sm:$0x1] }
  0x25   : > { %v325_v33 = vadd.s32 %v324_v32, %v260_v25 }
  0x26   : > { %300 = vmatpush.msra.mxu0 %v293_v7 }
  0x27   : > { %562 = vset.pattern.permute.xlu0 %v669_v9  ;;  %564 = vset.pattern.permute.xlu1 %v670_v10  ;;  %vm326_vm8 = vcmp.lt.s32.totalorder %v325_v33, 70 }
  0x28   : > { %266 = vperm.xlu0 %562, %v258_v1   ;;  %276 = vperm.xlu1 %564, %v258_v1  }
  0x29   : > { %301 = vmatpush.msra.mxu0 %v292_v8 }
  0x2b   : > { %302 = vmatpush.msra.mxu0 %v291_v11 }
  0x2d   : > { %303 = vmatpush.msra.mxu0 %v290_v12 }
  0x2f   : > { %304 = vmatpush.msra.mxu0 %v289_v13 }
  0x30   : > { %565 = vset.pattern.permute.xlu0 %v670_v10 }
  0x31   : > { %305 = vmatpush.msra.mxu0 %v288_v14 }
  0x33   : > { %306 = vmatpush.msra.mxu0 %v287_v15 }
  0x35   : > { %307 = vmatpush.msra.mxu0 %v286_v16 }
  0x37   : > { %308 = vmatpush.msra.mxu0 %v285_v17 }
  0x39   : > { %309 = vmatpush.msra.mxu0 %v284_v18 }
  0x3b   : > { %310 = vmatpush.msra.mxu0 %v283_v19 }
  0x3d   : > { %311 = vmatpush.msra.mxu0 %v282_v20 }
  0x3f   : > { %312 = vmatpush.msra.mxu0 %v281_v21 }
  0x91   : > { %v263_v22 = vpop.permute.xlu0 %262  ;;  %v272_v23 = vpop.permute.xlu1 %271 }
  0x92   : > { %vm264_vm1 = vcmp.eq.s32.totalorder %v260_v25, %v263_v22  ;;  %vm273_vm4 = vcmp.eq.s32.totalorder %v260_v25, %v272_v23 }
  0x9a   : > { %v267_v26 = vpop.permute.xlu0 %266  ;;  %v277_v27 = vpop.permute.xlu1 %276 }
  0x9b   : > { %vm268_vm2 = vcmp.eq.s32.totalorder %v260_v25, %v267_v26  ;;  %vm278_vm3 = vcmp.eq.s32.totalorder %v260_v25, %v277_v27 }
  0x9c   : > { %vm269_vm5 = vmor %vm264_vm1, %vm268_vm2 }
  0x9d   : > { %vm274_vm6 = vmor %vm269_vm5, %vm273_vm4 }
  0x9e   : > { %vm279_vm7 = vmor %vm274_vm6, %vm278_vm3 }
  0x9f   : > { %476 = vmatmul.msk.f32.vlgmr.msra.gmra.mxu0 %vm279_vm7, %v257_v28 }
 0x11c   : > { %v314_v34 = vpop.f32.mrf.mxu0 }
 0x11d   : > { %v327_v35 = vsel %vm326_vm8, %v314_v34, 1.0 }
 0x11e   : > { %566 = vlog2.f32 %v327_v35 }
 0x124   : > { %v567_v36 = vpop.eup %566 }
 0x125   : > { %v329_v37 = vmul.f32 0.6931472, %v567_v36 }
 0x127   : > { %v331_v38 = vsel %vm330_vm9, %v329_v37, 0.0 }
 0x128   : > { %v332_v39 = vrot.slane %v331_v38, 4 }
 0x12a   : > { %v333_v40 = vadd.f32 %v332_v39, %v331_v38 }
 0x12c   : > { %v334_v41 = vrot.slane %v333_v40, 2 }
 0x12e   : > { %v335_v42 = vadd.f32 %v334_v41, %v333_v40 }
 0x130   : > { %v336_v43 = vrot.slane %v335_v42, 1 }
 0x132   : > { %v337_v44 = vadd.f32 %v336_v43, %v335_v42 }
 0x134   : > { %v339_v45 = vsel %vm330_vm9, %v337_v44, 0.0 }
 0x135   : > { %340 = vadd.xlane.f32.xlu2 %v339_v45 }
 0x1a7   : > { %348 = sbr.rel (%p479_p0) target bundleno = 551 (0x227), region = 40 }
 0x1a8   : > { %v341_v47 = vpop.xlane.xlu2 %340 }
 0x1a9   : > { %v342_v48 = vadd.f32 %v341_v47, %v338_v46 }
 0x1ab   : > { %344 = vst.msk [vmem:[#allocation2] sm:$0x1] %vm343_vm10, %v342_v48 }
 0x1ac   : > { %v671_v50 = vmov 0  }
 0x1ad   : > { %568 = vset.pattern.permute.xlu0 %v671_v50 }
 0x1b2   : > { %v569_v49 = vld [vmem:[#allocation2] ss:$0 sm:$0xff] }
 0x1b3   : > { %353 = vperm.xlu0 %568, %v569_v49  }
 0x225   : > { %v354_v51 = vpop.permute.xlu0 %353 }
 0x226   : > { %356 = vst [vmem:[%s226_s26] sm:$0xff] %v354_v51 }
 0x227 PF: > { %s481_s5 = sshll.u32 %s652_s16, 3  ;;  %s370_s15 = sshll.u32 %s226_s26, 4  ;;  %s371_s15 = int_to_ptr.vmem [resolvable:$true] %s370_s15 }
 0x228   : > { %s368_s9 = scalar_lea.hbm %s884_s3, %s481_s5  ;;  %s888_s20 = sand.u32 1, %s640_s13  }
 0x229   : > { %s372_s11 = sshll.u32 %s368_s9, 4  ;;  %s358_s21 = scalar_lea.sflag [#allocation4], %s888_s20  ;;  %s373_s11 = int_to_ptr.hbm [resolvable:$true] %s372_s11 }
 0x22a   : > { %s584_s27 = sshra.s32 %s373_s11, 4  ;;  %s590_s7 = scalar_lea.hbm %s884_s3, 16  ;;  %s585_s27 = int_to_ptr.hbm [resolvable:$true] %s584_s27 }
 0x22b   : > { %s586_s30 = scalar_lea.hbm %s585_s27, 8  ;;  %p591_p5 = scmp.lt.s32.totalorder %s585_s27, %s884_s3 }
 0x22c   : > { %p587_p1 = scmp.ne.s32.totalorder %s585_s27, %s586_s30  ;;  %p592_p6 = scmp.lt.s32.totalorder %s590_s7, %s586_s30 }
 0x22e   : > { %p588_p2 = pnand %p587_p1, %p741_p3  ;;  %p593_p7 = por %p592_p6, %p591_p5 }
 0x230   : > { %p589_p4 = pneg %p588_p2 }
 0x232   : > { %p594_p8 = pnand %p593_p7, %p589_p4 }
 0x234   : > { %597 = shalt.err (!%p594_p8)
}
 0x235   : > { %484 = dma.vmem_to_hbm [thread:$0]  (%p741_p3), %s371_s15, 128, %s373_s11, %s358_s21  }
 0x236 PF: > { %p490_p10 = scmp.ge.s32.totalorder %s664_s19, 2  ;;  %s384_s4 = sand.u32 1, %s636_s12  }
 0x237   : > { %s385_s26 = scalar_lea.sflag [#allocation4], %s384_s4 }
 0x238   : > { %p487_p11 = pnand %p490_p10, %p751_p9 }
 0x23a   : > { %p488_p12 = pneg %p487_p11 }
 0x23c   : > { %631 = dma.done.wait (%p488_p12), %s385_s26, 128  }
 0x23d   : > { %633 = vsyncadd (%p488_p12), %s385_s26, 4294967168  ;;  %s16_s19 = sadd.s32 1, %s664_s19   ;;  %s889_s12 = smov %s640_s13 }
 0x23e   : > { %p13_p13 = scmp.ge.s32.totalorder %s16_s19, 6   ;;  %s890_s13 = smov %s644_s14 }
 0x23f   : > { %s891_s14 = smov %s759_s28  ;;  %s892_s15 = smov %s656_s17 }
 0x240   : > { %s893_s16 = smov %s660_s18  ;;  %s894_s17 = smov %s897_s22 }
 0x241   : > { %s895_s18 = smov %s901_s23  ;;  %15 = sbr.rel (!%p13_p13) target bundleno = 5 (0x5), region = 78 }
 0x246   :  { %391 = vsyncpa [#allocation4], 1 }
 0x247   :  { %393 = vsyncpa [#allocation4 + $0x1], 1 }

</bundles_post_ra>
